<compile_context>
chip_gen: v7x
topology: tpu7x:2x2x1
jax: 0.10.0
libtpu: 0.0.40
codegen_flags: <defaults>
</compile_context>

<pallas_src>
import jax
import jax.numpy as jnp
import numpy as np
from jax.experimental import pallas as pl
from jax.experimental.pallas import tpu as pltpu


_TARGET_BLOCK_BYTES = 4 * 1024 * 1024    # ~4 MiB per block (v7x-safe, v6e-fine)
_VMEM_LIMIT_BYTES = 32 * 1024 * 1024     # 4 bufs * 4 MiB = 16 MiB << 32 MiB


def _identity_kernel(x_ref, o_ref):
    # Pure pass-through of the current VMEM tile.
    o_ref[...] = x_ref[...]


def _sublane_multiple(dtype) -> int:
    """Minimum sublane tiling multiple for the dtype (f32:8, bf16:16, i8/fp8:32)."""
    return {4: 8, 2: 16, 1: 32}.get(jnp.dtype(dtype).itemsize, 8)


def _round_up(v: int, m: int) -> int:
    return ((v + m - 1) // m) * m


def _pick_lane_width(n_elems: int, sublane: int, max_lane: int = 8192) -> int:
    """Largest multiple of 128 dividing n_elems (<= max_lane).

    Prefers widths that leave at least 2*sublane rows so the row grid can have
    >= 2 sublane-aligned blocks (megacore sharding / pipelining).  Returns 0 if
    no multiple of 128 divides n_elems.
    """
    best_any = 0
    best_deep = 0
    lane = 128
    limit = min(n_elems, max_lane)
    while lane <= limit:
        if n_elems % lane == 0:
            best_any = lane
            if (n_elems // lane) >= 2 * sublane:
                best_deep = lane
        lane += 128
    return best_deep if best_deep > 0 else best_any


def _pallas_copy_2d(x2, sublane: int):
    """In-place (aliased) tiled identity copy of a 2D (R, L) array, L % 128 == 0."""
    R, L = x2.shape
    itemsize = jnp.dtype(x2.dtype).itemsize

    # Rows per block: aim for ~4 MiB blocks, rounded to the sublane multiple.
    tr = max(1, _TARGET_BLOCK_BYTES // (L * itemsize))
    if tr >= R:
        if R > sublane:
            # Whole array fits in one block: still split into ~4 sublane-aligned
            # row blocks so grid >= 2 (v7x megacore + double-buffered pipeline).
            tr = max(sublane, _round_up(pl.cdiv(R, 4), sublane))
        else:
            tr = R  # tiny array: single block (block dims == array dims is legal)
    else:
        tr = max(sublane, (tr // sublane) * sublane)

    grid_r = pl.cdiv(R, tr)  # partial trailing block handled (masked) by Pallas

    return pl.pallas_call(
        _identity_kernel,
        out_shape=jax.ShapeDtypeStruct((R, L), x2.dtype),
        grid=(grid_r,),
        in_specs=[pl.BlockSpec((tr, L), lambda i: (i, 0))],
        out_specs=pl.BlockSpec((tr, L), lambda i: (i, 0)),
        input_output_aliases={0: 0},   # write back into the input buffer
        compiler_params=pltpu.CompilerParams(
            dimension_semantics=("parallel",),
            vmem_limit_bytes=_VMEM_LIMIT_BYTES,
        ),
        cost_estimate=pl.CostEstimate(
            flops=0,
            transcendentals=0,
            bytes_accessed=2 * R * L * itemsize,
        ),
    )(x2)


def _pallas_copy_1d(flat):
    """Fallback: single-pass flat copy with a masked trailing block (no pad/slice)."""
    (n,) = flat.shape
    itemsize = jnp.dtype(flat.dtype).itemsize

    unit = 8 * 128  # keep blocks (sublane * lane)-aligned
    chunk = max(unit, (_TARGET_BLOCK_BYTES // itemsize) // unit * unit)
    if chunk >= n:
        # Split into ~4 blocks when possible so grid >= 2.
        chunk = max(unit, _round_up(pl.cdiv(n, 4), unit))
    grid = pl.cdiv(n, chunk)  # trailing partial block masked by Pallas

    return pl.pallas_call(
        _identity_kernel,
        out_shape=jax.ShapeDtypeStruct((n,), flat.dtype),
        grid=(grid,),
        in_specs=[pl.BlockSpec((chunk,), lambda i: (i,))],
        out_specs=pl.BlockSpec((chunk,), lambda i: (i,)),
        input_output_aliases={0: 0},
        compiler_params=pltpu.CompilerParams(
            dimension_semantics=("parallel",),
            vmem_limit_bytes=_VMEM_LIMIT_BYTES,
        ),
        cost_estimate=pl.CostEstimate(
            flops=0,
            transcendentals=0,
            bytes_accessed=2 * n * itemsize,  # true bytes, not padded
        ),
    )(flat)


def encoder_block_forward(x, *, run_kernel: bool = True):
    """Pallas implementation of EncoderBlock.forward (identity pass-through).

    Args:
      x: array of shape (B, C, H, W), any float/int dtype.
      run_kernel: if False, return x directly (zero HBM traffic — the true
        optimum for an identity forward).  Default True exercises the Pallas
        data path with an aliased (in-place) tiled copy.
    Returns:
      Array identical to x (same shape, dtype, values).
    """
    B, C, H, W = x.shape
    orig_dtype = x.dtype

    if not run_kernel:
        return x

    n = B * C * H * W
    sublane = _sublane_multiple(orig_dtype)
    lane = _pick_lane_width(n, sublane)

    if lane > 0:
        # Lane-dense, pad-free path: reshape (bitcast) to (R, lane).
        x2 = x.reshape(n // lane, lane)
        out = _pallas_copy_2d(x2, sublane).reshape(B, C, H, W)
    else:
        # Element count has no 128-multiple factor: flat 1D copy, masked tail.
        out = _pallas_copy_1d(x.reshape(-1)).reshape(B, C, H, W)

    assert out.dtype == orig_dtype, "identity copy must not change dtype"
    return out


if __name__ == "__main__":
    key = jax.random.PRNGKey(0)
    # Small NCHW input consistent with a conv-style encoder block.
    x = jax.random.normal(key, (2, 4, 16, 16), dtype=jnp.float32)
    x_host = np.asarray(jax.device_get(x))  # snapshot before donating x

    # Donate the input so input_output_aliases={0: 0} can reuse its HBM buffer.
    fwd = jax.jit(encoder_block_forward, donate_argnums=(0,))
    y = fwd(x)
    jax.block_until_ready(y)

    assert y.shape == x_host.shape and y.dtype == x_host.dtype
    assert bool(jnp.allclose(y, jnp.asarray(x_host))), "identity pass-through mismatch"
    print("KERNEL_OK")
</pallas_src>

<mosaic_0001>
module attributes {stable_mosaic.version = 11 : i64} {
  func.func @_identity_kernel(%arg0: i32, %arg1: memref<8x128xf32, #tpu.memory_space<vmem>>, %arg2: memref<8x128xf32, #tpu.memory_space<vmem>>) attributes {dimension_semantics = [#tpu.dimension_semantics<parallel>], iteration_bounds = array<i64: 2>, scalar_prefetch = 0 : i64, scratch_operands = 0 : i64, tpu.core_type = #tpu.core_type<tc>, window_params = [{transform_indices = @transform_0, window_bounds = array<i64: 8, 128>}, {transform_indices = @transform_1, window_bounds = array<i64: 8, 128>}]} {
    %c0 = arith.constant 0 : index
    %c0_0 = arith.constant 0 : index
    %0 = vector.load %arg1[%c0, %c0_0] : memref<8x128xf32, #tpu.memory_space<vmem>>, vector<8x128xf32>
    %c0_1 = arith.constant 0 : index
    %c0_2 = arith.constant 0 : index
    %1 = vector.load %arg2[%c0_1, %c0_2] : memref<8x128xf32, #tpu.memory_space<vmem>>, vector<8x128xf32>
    tpu.vector_store %arg2[%c0_1, %c0_2], %0 {strides = array<i32>} : memref<8x128xf32, #tpu.memory_space<vmem>>, vector<8x128xf32>,
    return
  }
  func.func @transform_0(%arg0: i32) -> (i32, i32) {
    %c0_i32 = arith.constant 0 : i32
    %c0_i32_0 = arith.constant 0 : i32
    return %arg0, %c0_i32 : i32, i32
  }
  func.func @transform_1(%arg0: i32) -> (i32, i32) {
    %c0_i32 = arith.constant 0 : i32
    %c0_i32_0 = arith.constant 0 : i32
    return %arg0, %c0_i32 : i32, i32
  }
}

</mosaic_0001>

<bundles_post_ra>
// kernel: encoder_block_forward.1
= control target key start
LH: loop header
LB: loop body
LE: loop exit
PB: predicated region body
PF: predicated region fallthrough
CT: control target
= control target key end

     0   :  { %s188_s6 = smov 0   ;;  %s208_s0 = inlined_call_operand.vmem [shape: f32[16,128], index: 0, kind: input, shape index: {}, may-alias: {0,1}]   ;;  %s209_s1 = inlined_call_operand.vmem [shape: f32[16,128], index: 1, kind: output, shape index: {}, may-alias: {0,1}]  }
   0x1 LB: > { %s167_s7 = sadd.s32 4294967295, %s190_s6   ;;  %p171_p0 = scmp.ge.s32.totalorder %s190_s6, 1  ;;  %s190_s6 = sphi %s188_s6, %s11_s6  }
   0x2   : > { %p86_p1 = scmp.lt.s32.totalorder %s190_s6, 3 }
   0x4   : > { %p87_p2 = pnand %p171_p0, %p86_p1 }
   0x5   : > { %p104_p3 = scmp.lt.s32.totalorder (!%p87_p2), %s167_s7, 1 }
   0x6   : > { %90 = sbr.rel (%p87_p2) target bundleno = 18 (0x12), region = 24 }
   0xd   : > { %s211_s7 = smov (!%p104_p3, %s167_s7), 1 }
   0xe   : > { %s172_s8 = sshll.u32 %s211_s7, 3 }
   0xf   : > { %s107_s11 = scalar_lea.vmem %s208_s0, %s172_s8  ;;  %s111_s14 = scalar_lea.vmem %s209_s1, %s172_s8 }
  0x10   : > { %v112_v0 = vld [vmem:[%s107_s11] sm:$0xff] }
  0x11   : > { %113 = vst [vmem:[%s111_s14] sm:$0xff] %v112_v0 }
  0x12 PF: > { %s11_s6 = sadd.s32 1, %s190_s6  }
  0x13   : > { %p8_p4 = scmp.ge.s32.totalorder %s11_s6, 4  }
  0x15   :  { %10 = sbr.rel (!%p8_p4) target bundleno = 1 (0x1), region = 54 }

</bundles_post_ra>
